<compile_context>
chip_gen: v7x
topology: tpu7x:2x2x1
jax: 0.10.0
libtpu: 0.0.40
codegen_flags: <defaults>
</compile_context>

<pallas_src>
import functools

import jax
import jax.numpy as jnp
from jax import lax
from jax.experimental import pallas as pl
from jax.experimental.pallas import tpu as pltpu

_OUT_LANES = 128  # lane-dense output row (avoids a masked partial store)


def _make_tsps_kernel(S, I, H, O, out_lanes):
    """Builds the fused LSTM-recurrence + Linear kernel for static (S, I, H, O)."""

    def kernel(x_ref, p_ref, out_ref):
        # Packed parameter layout (rows of a (H+I+O+2, 4H) f32 buffer):
        #   rows [0, H)            W_hh^T   (g-block columns pre-scaled by 2)
        #   rows [H, H+I)          W_ih^T   (g-block columns pre-scaled by 2)
        #   row  H+I               b_ih+b_hh (g block pre-scaled by 2)
        #   rows [H+I+1, H+I+1+O)  Linear weight rows, zero-padded to 4H lanes
        #   row  H+I+1+O           Linear bias, lane o holds b_lin[o]
        whh = p_ref[0:H, :]                        # (H, 4H)
        wih = p_ref[H:H + I, :]                    # (I, 4H)
        b = p_ref[H + I:H + I + 1, :]              # (1, 4H)

        x = x_ref[...]                             # (S, I)

        # Input projection on the VPU: K == I is tiny, so an MXU matmul here
        # would be an outer product paying full fill/drain for <1% utilization.
        xg = x[:, 0:1] * wih[0:1, :]
        for k in range(1, I):
            xg = xg + x[:, k:k + 1] * wih[k:k + 1, :]
        xg = xg + b                                # (S, 4H)

        h = jnp.zeros((1, H), jnp.float32)         # initial hidden state
        c = jnp.zeros((1, H), jnp.float32)         # initial cell state

        # Fully unrolled recurrence; h/c live in vregs (no VMEM round trips).
        # TODO(synk): keep W_hh resident in the MXU across the S serial steps
        #   via pltpu.matmul_push_rhs / matmul_acc_lhs instead of re-streaming
        #   it through jnp.dot each step (fill cost sits on the dep chain).
        # TODO(synk): bf16 operands for this dot cut per-step MXU latency ~3x
        #   on v6e/v7x but loosen the 1e-4 tolerance; kept f32 for exactness.
        for t in range(S):
            gates = xg[t:t + 1, :] + jnp.dot(
                h, whh, preferred_element_type=jnp.float32)    # (1, 4H)
            # ONE full-width sigmoid (single EUP pass covers all 4 gate blocks);
            # g-block pre-activations were scaled by 2, so tanh(x)=2*sigmoid(2x)-1.
            sig = jax.nn.sigmoid(gates)
            i_g = sig[:, 0:H]
            f_g = sig[:, H:2 * H]
            g_g = 2.0 * sig[:, 2 * H:3 * H] - 1.0
            o_g = sig[:, 3 * H:4 * H]
            c = f_g * c + i_g * g_g
            h = o_g * jnp.tanh(c)

        # Final Linear on the VPU/XLU: N == O is tiny, skip the MXU entirely.
        wlin = p_ref[H + I + 1:H + I + 1 + O, :]               # (O, 4H)
        blin = p_ref[H + I + 1 + O:H + I + 2 + O, :]           # (1, 4H)
        preds = []
        for o in range(O):
            p_o = jnp.sum(h * wlin[o:o + 1, 0:H], axis=-1,
                          keepdims=True) + blin[:, o:o + 1]    # (1, 1)
            preds.append(p_o)
        pred = preds[0] if O == 1 else jnp.concatenate(preds, axis=-1)

        if out_lanes == O:
            out_ref[...] = pred
        else:
            # Lane-dense write (O == 1): broadcast the scalar over all lanes so
            # the store is a full, unmasked vst; wrapper slices [:O].
            out_ref[...] = jnp.broadcast_to(pred, (1, out_lanes))

    return kernel


@functools.lru_cache(maxsize=None)
def _build_forward(S, I, H, O):
    out_lanes = _OUT_LANES if O == 1 else O
    kernel = _make_tsps_kernel(S, I, H, O, out_lanes)

    @jax.jit
    def fwd(x, packed):
        out = pl.pallas_call(
            kernel,
            out_shape=jax.ShapeDtypeStruct((1, out_lanes), jnp.float32),
            # Two inputs only (x + one packed param buffer): 2 prologue DMA
            # descriptors / semaphore waits instead of 6.
            in_specs=[pl.BlockSpec(memory_space=pltpu.MemorySpace.VMEM)] * 2,
            out_specs=pl.BlockSpec(memory_space=pltpu.MemorySpace.VMEM),
        )(x, packed)
        return out[0, :O]

    return fwd


def prepare_params(params):
    """One-time parameter preprocessing (kept OUT of the per-call path).

    Folds the transpose, bias sum, the 2x g-block scale (for the
    tanh == 2*sigmoid(2x)-1 trick) and the Linear layer into a single
    lane-dense (H+I+O+2, 4H) float32 buffer.
    """
    w_ih, w_hh, b_ih, b_hh, w_lin, b_lin = (
        params["w_ih"], params["w_hh"], params["b_ih"], params["b_hh"],
        params["w_lin"], params["b_lin"],
    )
    H = w_hh.shape[1]
    G = 4 * H
    I = w_ih.shape[1]
    O = w_lin.shape[0]

    # Column scale: 2x on the g block so a single sigmoid recovers tanh.
    scale = jnp.concatenate([
        jnp.ones((2 * H,), jnp.float32),
        2.0 * jnp.ones((H,), jnp.float32),
        jnp.ones((H,), jnp.float32),
    ])                                                           # (4H,)

    whh_t = (jnp.transpose(w_hh).astype(jnp.float32) * scale)    # (H, 4H)
    wih_t = (jnp.transpose(w_ih).astype(jnp.float32) * scale)    # (I, 4H)
    b = ((b_ih + b_hh).astype(jnp.float32) * scale).reshape(1, G)

    wlin_rows = jnp.zeros((O, G), jnp.float32).at[:, 0:H].set(
        w_lin.astype(jnp.float32))                               # (O, 4H)
    blin_row = jnp.zeros((1, G), jnp.float32).at[0, 0:O].set(
        b_lin.astype(jnp.float32))                               # (1, 4H)

    packed = jnp.concatenate([whh_t, wih_t, b, wlin_rows, blin_row], axis=0)
    return {
        "packed": packed,              # (H + I + O + 2, 4H) float32
        "input_size": int(I),
        "hidden_size": int(H),
        "output_size": int(O),
    }


def tsps_forward(input_seq, prepped):
    """Pallas equivalent of TSPSModel.forward(input_seq) -> shape (O,).

    Assumes a single sequence (batch == 1, as in input_seq.view(S, 1, -1)) and
    recompiles per seq_len (the recurrence is statically unrolled).
    TODO(synk): for many independent sequences, add a "parallel" batch grid
    axis (fills the MXU M-dim and v7x's second TensorCore).
    """
    I = prepped["input_size"]
    H = prepped["hidden_size"]
    O = prepped["output_size"]
    S = int(input_seq.shape[0])
    x = jnp.asarray(input_seq, jnp.float32).reshape(S, I)        # (S, I)
    fwd = _build_forward(S, I, H, O)
    return fwd(x, prepped["packed"])


def _reference_forward(input_seq, params):
    """Plain-JAX reference replicating torch nn.LSTM + nn.Linear semantics."""
    w_ih, w_hh, b_ih, b_hh, w_lin, b_lin = (
        params["w_ih"], params["w_hh"], params["b_ih"], params["b_hh"],
        params["w_lin"], params["b_lin"],
    )
    H = w_hh.shape[1]
    x = input_seq.reshape(input_seq.shape[0], -1).astype(jnp.float32)

    def step(carry, x_t):
        h, c = carry
        gates = x_t @ w_ih.T + b_ih + h @ w_hh.T + b_hh
        i = jax.nn.sigmoid(gates[0:H])
        f = jax.nn.sigmoid(gates[H:2 * H])
        g = jnp.tanh(gates[2 * H:3 * H])
        o = jax.nn.sigmoid(gates[3 * H:4 * H])
        c = f * c + i * g
        h = o * jnp.tanh(c)
        return (h, c), h

    (h, _), _ = lax.scan(step, (jnp.zeros(H), jnp.zeros(H)), x)
    return h @ w_lin.T + b_lin


def init_params(key, input_size=1, hidden_size=32, output_size=1):
    """Deterministic uniform(-1/sqrt(H), 1/sqrt(H)) init (PyTorch-style)."""
    k = 1.0 / jnp.sqrt(jnp.float32(hidden_size))
    keys = jax.random.split(key, 6)
    u = lambda kk, shape: jax.random.uniform(kk, shape, jnp.float32, -k, k)
    return {
        "w_ih": u(keys[0], (4 * hidden_size, input_size)),
        "w_hh": u(keys[1], (4 * hidden_size, hidden_size)),
        "b_ih": u(keys[2], (4 * hidden_size,)),
        "b_hh": u(keys[3], (4 * hidden_size,)),
        "w_lin": u(keys[4], (output_size, hidden_size)),
        "b_lin": u(keys[5], (output_size,)),
    }


if __name__ == "__main__":
    key = jax.random.PRNGKey(0)
    pkey, xkey = jax.random.split(key)

    input_size, hidden_size, output_size, seq_len = 1, 32, 1, 8
    params = init_params(pkey, input_size, hidden_size, output_size)
    input_seq = jax.random.normal(xkey, (seq_len,), dtype=jnp.float32)

    prepped = prepare_params(params)          # one-time preprocessing
    out = tsps_forward(input_seq, prepped)
    out = jax.block_until_ready(out)

    ref = _reference_forward(input_seq, params)
    assert out.shape == (output_size,)
    assert jnp.allclose(out, ref, atol=1e-4, rtol=1e-4), (out, ref)

    print("KERNEL_OK")
</pallas_src>

<mosaic_0001>
module attributes {stable_mosaic.version = 11 : i64} {
  func.func @kernel(%arg0: memref<8x1xf32, #tpu.memory_space<vmem>>, %arg1: memref<36x128xf32, #tpu.memory_space<vmem>>, %arg2: memref<1x128xf32, #tpu.memory_space<vmem>>) attributes {dimension_semantics = [], scalar_prefetch = 0 : i64, scratch_operands = 0 : i64, tpu.core_type = #tpu.core_type<tc>} {
    %c0 = arith.constant 0 : index
    %c0_0 = arith.constant 0 : index
    %0 = vector.load %arg1[%c0, %c0_0] : memref<36x128xf32, #tpu.memory_space<vmem>>, vector<32x128xf32>
    %c32 = arith.constant 32 : index
    %c0_1 = arith.constant 0 : index
    %1 = vector.load %arg1[%c32, %c0_1] : memref<36x128xf32, #tpu.memory_space<vmem>>, vector<1x128xf32>
    %c33 = arith.constant 33 : index
    %c0_2 = arith.constant 0 : index
    %2 = vector.load %arg1[%c33, %c0_2] : memref<36x128xf32, #tpu.memory_space<vmem>>, vector<1x128xf32>
    %c0_3 = arith.constant 0 : index
    %c0_4 = arith.constant 0 : index
    %3 = vector.load %arg0[%c0_3, %c0_4] : memref<8x1xf32, #tpu.memory_space<vmem>>, vector<8x1xf32>
    %4 = vector.broadcast %3 : vector<8x1xf32> to vector<8x128xf32>
    %5 = vector.broadcast %1 : vector<1x128xf32> to vector<8x128xf32>
    %6 = arith.mulf %4, %5 : vector<8x128xf32>
    %7 = vector.broadcast %2 : vector<1x128xf32> to vector<8x128xf32>
    %8 = arith.addf %6, %7 : vector<8x128xf32>
    %cst = arith.constant 0.000000e+00 : f32
    %9 = vector.broadcast %cst : f32 to vector<1x32xf32>
    %cst_5 = arith.constant 0.000000e+00 : f32
    %10 = vector.broadcast %cst_5 : f32 to vector<1x32xf32>
    %11 = vector.extract_strided_slice %8 {offsets = [0, 0], sizes = [1, 128], strides = [1, 1]} : vector<8x128xf32> to vector<1x128xf32>
    %cst_6 = arith.constant dense<0.000000e+00> : vector<1x128xf32>
    %12 = tpu.matmul %9, %0, %cst_6 {dimension_numbers = #tpu.dot_dimension_numbers<[1], [0], [0], [1], [0, 0, 1, 1], [], []>} : vector<1x32xf32>, vector<32x128xf32>, vector<1x128xf32> -> vector<1x128xf32>
    %13 = arith.addf %11, %12 : vector<1x128xf32>
    %14 = arith.negf %13 : vector<1x128xf32>
    %15 = math.exp %14 : vector<1x128xf32>
    %cst_7 = arith.constant 1.000000e+00 : f32
    %16 = vector.broadcast %cst_7 : f32 to vector<1x128xf32>
    %17 = arith.addf %16, %15 : vector<1x128xf32>
    %18 = arith.divf %16, %17 : vector<1x128xf32>
    %19 = vector.extract_strided_slice %18 {offsets = [0, 0], sizes = [1, 32], strides = [1, 1]} : vector<1x128xf32> to vector<1x32xf32>
    %20 = vector.extract_strided_slice %18 {offsets = [0, 32], sizes = [1, 32], strides = [1, 1]} : vector<1x128xf32> to vector<1x32xf32>
    %21 = vector.extract_strided_slice %18 {offsets = [0, 64], sizes = [1, 32], strides = [1, 1]} : vector<1x128xf32> to vector<1x32xf32>
    %cst_8 = arith.constant 2.000000e+00 : f32
    %22 = vector.broadcast %cst_8 : f32 to vector<1x32xf32>
    %23 = arith.mulf %22, %21 : vector<1x32xf32>
    %cst_9 = arith.constant 1.000000e+00 : f32
    %24 = vector.broadcast %cst_9 : f32 to vector<1x32xf32>
    %25 = arith.subf %23, %24 : vector<1x32xf32>
    %26 = vector.extract_strided_slice %18 {offsets = [0, 96], sizes = [1, 32], strides = [1, 1]} : vector<1x128xf32> to vector<1x32xf32>
    %27 = arith.mulf %20, %10 : vector<1x32xf32>
    %28 = arith.mulf %19, %25 : vector<1x32xf32>
    %29 = arith.addf %27, %28 : vector<1x32xf32>
    %30 = math.tanh %29 : vector<1x32xf32>
    %31 = arith.mulf %26, %30 : vector<1x32xf32>
    %32 = vector.extract_strided_slice %8 {offsets = [1, 0], sizes = [1, 128], strides = [1, 1]} : vector<8x128xf32> to vector<1x128xf32>
    %cst_10 = arith.constant dense<0.000000e+00> : vector<1x128xf32>
    %33 = tpu.matmul %31, %0, %cst_10 {dimension_numbers = #tpu.dot_dimension_numbers<[1], [0], [0], [1], [0, 0, 1, 1], [], []>} : vector<1x32xf32>, vector<32x128xf32>, vector<1x128xf32> -> vector<1x128xf32>
    %34 = arith.addf %32, %33 : vector<1x128xf32>
    %35 = arith.negf %34 : vector<1x128xf32>
    %36 = math.exp %35 : vector<1x128xf32>
    %cst_11 = arith.constant 1.000000e+00 : f32
    %37 = vector.broadcast %cst_11 : f32 to vector<1x128xf32>
    %38 = arith.addf %37, %36 : vector<1x128xf32>
    %39 = arith.divf %37, %38 : vector<1x128xf32>
    %40 = vector.extract_strided_slice %39 {offsets = [0, 0], sizes = [1, 32], strides = [1, 1]} : vector<1x128xf32> to vector<1x32xf32>
    %41 = vector.extract_strided_slice %39 {offsets = [0, 32], sizes = [1, 32], strides = [1, 1]} : vector<1x128xf32> to vector<1x32xf32>
    %42 = vector.extract_strided_slice %39 {offsets = [0, 64], sizes = [1, 32], strides = [1, 1]} : vector<1x128xf32> to vector<1x32xf32>
    %cst_12 = arith.constant 2.000000e+00 : f32
    %43 = vector.broadcast %cst_12 : f32 to vector<1x32xf32>
    %44 = arith.mulf %43, %42 : vector<1x32xf32>
    %cst_13 = arith.constant 1.000000e+00 : f32
    %45 = vector.broadcast %cst_13 : f32 to vector<1x32xf32>
    %46 = arith.subf %44, %45 : vector<1x32xf32>
    %47 = vector.extract_strided_slice %39 {offsets = [0, 96], sizes = [1, 32], strides = [1, 1]} : vector<1x128xf32> to vector<1x32xf32>
    %48 = arith.mulf %41, %29 : vector<1x32xf32>
    %49 = arith.mulf %40, %46 : vector<1x32xf32>
    %50 = arith.addf %48, %49 : vector<1x32xf32>
    %51 = math.tanh %50 : vector<1x32xf32>
    %52 = arith.mulf %47, %51 : vector<1x32xf32>
    %53 = vector.extract_strided_slice %8 {offsets = [2, 0], sizes = [1, 128], strides = [1, 1]} : vector<8x128xf32> to vector<1x128xf32>
    %cst_14 = arith.constant dense<0.000000e+00> : vector<1x128xf32>
    %54 = tpu.matmul %52, %0, %cst_14 {dimension_numbers = #tpu.dot_dimension_numbers<[1], [0], [0], [1], [0, 0, 1, 1], [], []>} : vector<1x32xf32>, vector<32x128xf32>, vector<1x128xf32> -> vector<1x128xf32>
    %55 = arith.addf %53, %54 : vector<1x128xf32>
    %56 = arith.negf %55 : vector<1x128xf32>
    %57 = math.exp %56 : vector<1x128xf32>
    %cst_15 = arith.constant 1.000000e+00 : f32
    %58 = vector.broadcast %cst_15 : f32 to vector<1x128xf32>
    %59 = arith.addf %58, %57 : vector<1x128xf32>
    %60 = arith.divf %58, %59 : vector<1x128xf32>
    %61 = vector.extract_strided_slice %60 {offsets = [0, 0], sizes = [1, 32], strides = [1, 1]} : vector<1x128xf32> to vector<1x32xf32>
    %62 = vector.extract_strided_slice %60 {offsets = [0, 32], sizes = [1, 32], strides = [1, 1]} : vector<1x128xf32> to vector<1x32xf32>
    %63 = vector.extract_strided_slice %60 {offsets = [0, 64], sizes = [1, 32], strides = [1, 1]} : vector<1x128xf32> to vector<1x32xf32>
    %cst_16 = arith.constant 2.000000e+00 : f32
    %64 = vector.broadcast %cst_16 : f32 to vector<1x32xf32>
    %65 = arith.mulf %64, %63 : vector<1x32xf32>
    %cst_17 = arith.constant 1.000000e+00 : f32
    %66 = vector.broadcast %cst_17 : f32 to vector<1x32xf32>
    %67 = arith.subf %65, %66 : vector<1x32xf32>
    %68 = vector.extract_strided_slice %60 {offsets = [0, 96], sizes = [1, 32], strides = [1, 1]} : vector<1x128xf32> to vector<1x32xf32>
    %69 = arith.mulf %62, %50 : vector<1x32xf32>
    %70 = arith.mulf %61, %67 : vector<1x32xf32>
    %71 = arith.addf %69, %70 : vector<1x32xf32>
    %72 = math.tanh %71 : vector<1x32xf32>
    %73 = arith.mulf %68, %72 : vector<1x32xf32>
    %74 = vector.extract_strided_slice %8 {offsets = [3, 0], sizes = [1, 128], strides = [1, 1]} : vector<8x128xf32> to vector<1x128xf32>
    %cst_18 = arith.constant dense<0.000000e+00> : vector<1x128xf32>
    %75 = tpu.matmul %73, %0, %cst_18 {dimension_numbers = #tpu.dot_dimension_numbers<[1], [0], [0], [1], [0, 0, 1, 1], [], []>} : vector<1x32xf32>, vector<32x128xf32>, vector<1x128xf32> -> vector<1x128xf32>
    %76 = arith.addf %74, %75 : vector<1x128xf32>
    %77 = arith.negf %76 : vector<1x128xf32>
    %78 = math.exp %77 : vector<1x128xf32>
    %cst_19 = arith.constant 1.000000e+00 : f32
    %79 = vector.broadcast %cst_19 : f32 to vector<1x128xf32>
    %80 = arith.addf %79, %78 : vector<1x128xf32>
    %81 = arith.divf %79, %80 : vector<1x128xf32>
    %82 = vector.extract_strided_slice %81 {offsets = [0, 0], sizes = [1, 32], strides = [1, 1]} : vector<1x128xf32> to vector<1x32xf32>
    %83 = vector.extract_strided_slice %81 {offsets = [0, 32], sizes = [1, 32], strides = [1, 1]} : vector<1x128xf32> to vector<1x32xf32>
    %84 = vector.extract_strided_slice %81 {offsets = [0, 64], sizes = [1, 32], strides = [1, 1]} : vector<1x128xf32> to vector<1x32xf32>
    %cst_20 = arith.constant 2.000000e+00 : f32
    %85 = vector.broadcast %cst_20 : f32 to vector<1x32xf32>
    %86 = arith.mulf %85, %84 : vector<1x32xf32>
    %cst_21 = arith.constant 1.000000e+00 : f32
    %87 = vector.broadcast %cst_21 : f32 to vector<1x32xf32>
    %88 = arith.subf %86, %87 : vector<1x32xf32>
    %89 = vector.extract_strided_slice %81 {offsets = [0, 96], sizes = [1, 32], strides = [1, 1]} : vector<1x128xf32> to vector<1x32xf32>
    %90 = arith.mulf %83, %71 : vector<1x32xf32>
    %91 = arith.mulf %82, %88 : vector<1x32xf32>
    %92 = arith.addf %90, %91 : vector<1x32xf32>
    %93 = math.tanh %92 : vector<1x32xf32>
    %94 = arith.mulf %89, %93 : vector<1x32xf32>
    %95 = vector.extract_strided_slice %8 {offsets = [4, 0], sizes = [1, 128], strides = [1, 1]} : vector<8x128xf32> to vector<1x128xf32>
    %cst_22 = arith.constant dense<0.000000e+00> : vector<1x128xf32>
    %96 = tpu.matmul %94, %0, %cst_22 {dimension_numbers = #tpu.dot_dimension_numbers<[1], [0], [0], [1], [0, 0, 1, 1], [], []>} : vector<1x32xf32>, vector<32x128xf32>, vector<1x128xf32> -> vector<1x128xf32>
    %97 = arith.addf %95, %96 : vector<1x128xf32>
    %98 = arith.negf %97 : vector<1x128xf32>
    %99 = math.exp %98 : vector<1x128xf32>
    %cst_23 = arith.constant 1.000000e+00 : f32
    %100 = vector.broadcast %cst_23 : f32 to vector<1x128xf32>
    %101 = arith.addf %100, %99 : vector<1x128xf32>
    %102 = arith.divf %100, %101 : vector<1x128xf32>
    %103 = vector.extract_strided_slice %102 {offsets = [0, 0], sizes = [1, 32], strides = [1, 1]} : vector<1x128xf32> to vector<1x32xf32>
    %104 = vector.extract_strided_slice %102 {offsets = [0, 32], sizes = [1, 32], strides = [1, 1]} : vector<1x128xf32> to vector<1x32xf32>
    %105 = vector.extract_strided_slice %102 {offsets = [0, 64], sizes = [1, 32], strides = [1, 1]} : vector<1x128xf32> to vector<1x32xf32>
    %cst_24 = arith.constant 2.000000e+00 : f32
    %106 = vector.broadcast %cst_24 : f32 to vector<1x32xf32>
    %107 = arith.mulf %106, %105 : vector<1x32xf32>
    %cst_25 = arith.constant 1.000000e+00 : f32
    %108 = vector.broadcast %cst_25 : f32 to vector<1x32xf32>
    %109 = arith.subf %107, %108 : vector<1x32xf32>
    %110 = vector.extract_strided_slice %102 {offsets = [0, 96], sizes = [1, 32], strides = [1, 1]} : vector<1x128xf32> to vector<1x32xf32>
    %111 = arith.mulf %104, %92 : vector<1x32xf32>
    %112 = arith.mulf %103, %109 : vector<1x32xf32>
    %113 = arith.addf %111, %112 : vector<1x32xf32>
    %114 = math.tanh %113 : vector<1x32xf32>
    %115 = arith.mulf %110, %114 : vector<1x32xf32>
    %116 = vector.extract_strided_slice %8 {offsets = [5, 0], sizes = [1, 128], strides = [1, 1]} : vector<8x128xf32> to vector<1x128xf32>
    %cst_26 = arith.constant dense<0.000000e+00> : vector<1x128xf32>
    %117 = tpu.matmul %115, %0, %cst_26 {dimension_numbers = #tpu.dot_dimension_numbers<[1], [0], [0], [1], [0, 0, 1, 1], [], []>} : vector<1x32xf32>, vector<32x128xf32>, vector<1x128xf32> -> vector<1x128xf32>
    %118 = arith.addf %116, %117 : vector<1x128xf32>
    %119 = arith.negf %118 : vector<1x128xf32>
    %120 = math.exp %119 : vector<1x128xf32>
    %cst_27 = arith.constant 1.000000e+00 : f32
    %121 = vector.broadcast %cst_27 : f32 to vector<1x128xf32>
    %122 = arith.addf %121, %120 : vector<1x128xf32>
    %123 = arith.divf %121, %122 : vector<1x128xf32>
    %124 = vector.extract_strided_slice %123 {offsets = [0, 0], sizes = [1, 32], strides = [1, 1]} : vector<1x128xf32> to vector<1x32xf32>
    %125 = vector.extract_strided_slice %123 {offsets = [0, 32], sizes = [1, 32], strides = [1, 1]} : vector<1x128xf32> to vector<1x32xf32>
    %126 = vector.extract_strided_slice %123 {offsets = [0, 64], sizes = [1, 32], strides = [1, 1]} : vector<1x128xf32> to vector<1x32xf32>
    %cst_28 = arith.constant 2.000000e+00 : f32
    %127 = vector.broadcast %cst_28 : f32 to vector<1x32xf32>
    %128 = arith.mulf %127, %126 : vector<1x32xf32>
    %cst_29 = arith.constant 1.000000e+00 : f32
    %129 = vector.broadcast %cst_29 : f32 to vector<1x32xf32>
    %130 = arith.subf %128, %129 : vector<1x32xf32>
    %131 = vector.extract_strided_slice %123 {offsets = [0, 96], sizes = [1, 32], strides = [1, 1]} : vector<1x128xf32> to vector<1x32xf32>
    %132 = arith.mulf %125, %113 : vector<1x32xf32>
    %133 = arith.mulf %124, %130 : vector<1x32xf32>
    %134 = arith.addf %132, %133 : vector<1x32xf32>
    %135 = math.tanh %134 : vector<1x32xf32>
    %136 = arith.mulf %131, %135 : vector<1x32xf32>
    %137 = vector.extract_strided_slice %8 {offsets = [6, 0], sizes = [1, 128], strides = [1, 1]} : vector<8x128xf32> to vector<1x128xf32>
    %cst_30 = arith.constant dense<0.000000e+00> : vector<1x128xf32>
    %138 = tpu.matmul %136, %0, %cst_30 {dimension_numbers = #tpu.dot_dimension_numbers<[1], [0], [0], [1], [0, 0, 1, 1], [], []>} : vector<1x32xf32>, vector<32x128xf32>, vector<1x128xf32> -> vector<1x128xf32>
    %139 = arith.addf %137, %138 : vector<1x128xf32>
    %140 = arith.negf %139 : vector<1x128xf32>
    %141 = math.exp %140 : vector<1x128xf32>
    %cst_31 = arith.constant 1.000000e+00 : f32
    %142 = vector.broadcast %cst_31 : f32 to vector<1x128xf32>
    %143 = arith.addf %142, %141 : vector<1x128xf32>
    %144 = arith.divf %142, %143 : vector<1x128xf32>
    %145 = vector.extract_strided_slice %144 {offsets = [0, 0], sizes = [1, 32], strides = [1, 1]} : vector<1x128xf32> to vector<1x32xf32>
    %146 = vector.extract_strided_slice %144 {offsets = [0, 32], sizes = [1, 32], strides = [1, 1]} : vector<1x128xf32> to vector<1x32xf32>
    %147 = vector.extract_strided_slice %144 {offsets = [0, 64], sizes = [1, 32], strides = [1, 1]} : vector<1x128xf32> to vector<1x32xf32>
    %cst_32 = arith.constant 2.000000e+00 : f32
    %148 = vector.broadcast %cst_32 : f32 to vector<1x32xf32>
    %149 = arith.mulf %148, %147 : vector<1x32xf32>
    %cst_33 = arith.constant 1.000000e+00 : f32
    %150 = vector.broadcast %cst_33 : f32 to vector<1x32xf32>
    %151 = arith.subf %149, %150 : vector<1x32xf32>
    %152 = vector.extract_strided_slice %144 {offsets = [0, 96], sizes = [1, 32], strides = [1, 1]} : vector<1x128xf32> to vector<1x32xf32>
    %153 = arith.mulf %146, %134 : vector<1x32xf32>
    %154 = arith.mulf %145, %151 : vector<1x32xf32>
    %155 = arith.addf %153, %154 : vector<1x32xf32>
    %156 = math.tanh %155 : vector<1x32xf32>
    %157 = arith.mulf %152, %156 : vector<1x32xf32>
    %158 = vector.extract_strided_slice %8 {offsets = [7, 0], sizes = [1, 128], strides = [1, 1]} : vector<8x128xf32> to vector<1x128xf32>
    %cst_34 = arith.constant dense<0.000000e+00> : vector<1x128xf32>
    %159 = tpu.matmul %157, %0, %cst_34 {dimension_numbers = #tpu.dot_dimension_numbers<[1], [0], [0], [1], [0, 0, 1, 1], [], []>} : vector<1x32xf32>, vector<32x128xf32>, vector<1x128xf32> -> vector<1x128xf32>
    %160 = arith.addf %158, %159 : vector<1x128xf32>
    %161 = arith.negf %160 : vector<1x128xf32>
    %162 = math.exp %161 : vector<1x128xf32>
    %cst_35 = arith.constant 1.000000e+00 : f32
    %163 = vector.broadcast %cst_35 : f32 to vector<1x128xf32>
    %164 = arith.addf %163, %162 : vector<1x128xf32>
    %165 = arith.divf %163, %164 : vector<1x128xf32>
    %166 = vector.extract_strided_slice %165 {offsets = [0, 0], sizes = [1, 32], strides = [1, 1]} : vector<1x128xf32> to vector<1x32xf32>
    %167 = vector.extract_strided_slice %165 {offsets = [0, 32], sizes = [1, 32], strides = [1, 1]} : vector<1x128xf32> to vector<1x32xf32>
    %168 = vector.extract_strided_slice %165 {offsets = [0, 64], sizes = [1, 32], strides = [1, 1]} : vector<1x128xf32> to vector<1x32xf32>
    %cst_36 = arith.constant 2.000000e+00 : f32
    %169 = vector.broadcast %cst_36 : f32 to vector<1x32xf32>
    %170 = arith.mulf %169, %168 : vector<1x32xf32>
    %cst_37 = arith.constant 1.000000e+00 : f32
    %171 = vector.broadcast %cst_37 : f32 to vector<1x32xf32>
    %172 = arith.subf %170, %171 : vector<1x32xf32>
    %173 = vector.extract_strided_slice %165 {offsets = [0, 96], sizes = [1, 32], strides = [1, 1]} : vector<1x128xf32> to vector<1x32xf32>
    %174 = arith.mulf %167, %155 : vector<1x32xf32>
    %175 = arith.mulf %166, %172 : vector<1x32xf32>
    %176 = arith.addf %174, %175 : vector<1x32xf32>
    %177 = math.tanh %176 : vector<1x32xf32>
    %178 = arith.mulf %173, %177 : vector<1x32xf32>
    %c34 = arith.constant 34 : index
    %c0_38 = arith.constant 0 : index
    %179 = vector.load %arg1[%c34, %c0_38] : memref<36x128xf32, #tpu.memory_space<vmem>>, vector<1x128xf32>
    %c35 = arith.constant 35 : index
    %c0_39 = arith.constant 0 : index
    %180 = vector.load %arg1[%c35, %c0_39] : memref<36x128xf32, #tpu.memory_space<vmem>>, vector<1x128xf32>
    %181 = vector.extract_strided_slice %179 {offsets = [0, 0], sizes = [1, 32], strides = [1, 1]} : vector<1x128xf32> to vector<1x32xf32>
    %182 = arith.mulf %178, %181 : vector<1x32xf32>
    %cst_40 = arith.constant dense<0.000000e+00> : vector<1xf32>
    %183 = vector.multi_reduction <add>, %182, %cst_40 [1] : vector<1x32xf32> to vector<1xf32>
    %184 = vector.shape_cast %183 : vector<1xf32> to vector<1x1xf32>
    %185 = vector.extract_strided_slice %180 {offsets = [0, 0], sizes = [1, 1], strides = [1, 1]} : vector<1x128xf32> to vector<1x1xf32>
    %186 = arith.addf %184, %185 : vector<1x1xf32>
    %187 = vector.shape_cast %186 : vector<1x1xf32> to vector<1x1xf32>
    %188 = vector.broadcast %187 : vector<1x1xf32> to vector<1x128xf32>
    %c0_41 = arith.constant 0 : index
    %c0_42 = arith.constant 0 : index
    %189 = vector.load %arg2[%c0_41, %c0_42] : memref<1x128xf32, #tpu.memory_space<vmem>>, vector<1x128xf32>
    tpu.vector_store %arg2[%c0_41, %c0_42], %188 {strides = array<i32>} : memref<1x128xf32, #tpu.memory_space<vmem>>, vector<1x128xf32>,
    return
  }
}

</mosaic_0001>

<bundles_post_ra>
// kernel: fwd.1
= control target key start
LH: loop header
LB: loop body
LE: loop exit
PB: predicated region body
PF: predicated region fallthrough
CT: control target
= control target key end

     0   :  { %7 = vsyncpa [#allocation3], 0  ;;  %s1409_s0 = inlined_call_operand.vmem [shape: f32[8,1], index: 0, kind: input, shape index: {}]   ;;  %s1410_s1 = inlined_call_operand.hbm [shape: f32[36,128], index: 1, kind: input, shape index: {}]   ;;  %s1411_s2 = inlined_call_operand.hbm [shape: f32[1,128], index: 2, kind: output, shape index: {}]  }
   0x1   :  { %8 = vsyncpa [#allocation4], 0  ;;  %s1254_s9 = smov [#allocation2]   ;;  %s1206_s13 = scalar_lea.hbm %s1410_s1, 640 }
   0x2   :  { %s16_s10 = sshll.u32 %s1254_s9, 4  ;;  %p1207_p0 = scmp.ne.s32.totalorder %s1410_s1, %s1206_s13  ;;  %s17_s10 = int_to_ptr.vmem [resolvable:$true] %s16_s10 }
   0x3   :  { %p1210_p1 = scmp.lt.u32.totalorder %s1206_s13, %s1410_s1 }
   0x5   :  { %p1212_p2 = pnand %p1210_p1, %p1207_p0 }
   0x7   :  { %1215 = shalt.err (!%p1212_p2)
}
   0x8   :  { %s1216_s18 = scalar_lea.vmem %s17_s10, 640  ;;  %p1221_p4 = scmp.lt.s32.totalorder %s17_s10, %s17_s10 }
   0x9   :  { %p1217_p3 = scmp.ne.s32.totalorder %s17_s10, %s1216_s18  ;;  %p1222_p5 = scmp.lt.s32.totalorder %s1216_s18, %s1216_s18 }
   0xb   :  { %p1223_p6 = por %p1222_p5, %p1221_p4 }
   0xd   :  { %p1224_p7 = pnand %p1223_p6, %p1217_p3 }
   0xf   :  { %1227 = shalt.err (!%p1224_p7)
}
  0x10   :  { %s1255_s19 = smov 128   ;;  %s1256_s20 = smov 8  }
  0x11   :  { %22 = dma.hbm_to_vmem [thread:$0]  %s1410_s1, 640, %s17_s10, [#allocation3], %s1255_s19, %s1255_s19, %s1256_s20  }
  0x12   :  { %1250 = dma.done.wait [#allocation3], 640  }
  0x13   :  { %1251 = vsyncadd [#allocation3], 4294966656  ;;  %v1257_v0 = vmov 0.0|0.0   ;;  %vm1258_vm0 = vmmov 0   ;;  %v1259_v1 = vmov 0.0   ;;  %v1260_v2 = vmov 0  }
  0x14   :  { %1097 = vmatprep.subr.bf16.mxu0 %v1257_v0  ;;  %1017 = vmatprep.mubr.msk.f32.mxu0 %vm1258_vm0, %v1259_v1  ;;  %v26_v3 = vld [vmem:[#allocation2] sm:$0xff]  ;;  %v27_v4 = vld [vmem:[#allocation2 + $0x8] sm:$0xff]  ;;  %v28_v5 = vld [vmem:[#allocation2 + $0x10] sm:$0xff]  ;;  %s1262_s24 = smov 32   ;;  %vm48_vm1 = vcmask 261120   ;;  %s1263_s25 = smov 96  }
  0x15   :  { %1156 = vset.pattern.permute.xlu0 %v1260_v2  ;;  %1103 = vmatprep.subr.bf16.mxu1 %v1257_v0  ;;  %v1298_v6 = vpack.c.bf16 %v27_v4, %v26_v3  ;;  %v29_v7 = vld [vmem:[#allocation2 + $0x18] sm:$0xff]  ;;  %v944_v11 = vld [vmem:[#allocation2 + $0x20] ss:$0 sm:$0xff]  ;;  %v945_v13 = vld [vmem:[#allocation2 + $0x21] ss:$0 sm:$0xff]  ;;  %vm915_vm2 = vcmask 261127  }
  0x16   :  { %1028 = vmatprep.mubr.msk.f32.mxu1 %vm1258_vm0, %v1259_v1  ;;  %1157 = vset.pattern.permute.xlu1 %v1260_v2  ;;  %v32_v8 = vld [vmem:[%s1409_s0] sm:$0xff]  ;;  %v1304_v9 = vpack.c.bf16 %v29_v7, %v28_v5  ;;  %s1261_s0 = smov 64   ;;  %s1264_s26 = smov [#allocation5]  }
  0x17   :  { %35 = vperm.xlu0 %1156, %v32_v8   ;;  %1099 = vmatpush3.bf16.msra.mxu0 %v1298_v6  ;;  %s935_s27 = sshll.u32 %s1264_s26, 4  ;;  %s936_s27 = int_to_ptr.vmem [resolvable:$true] %s935_s27 }
  0x18   :  { %1105 = vmatpush3.bf16.msra.mxu1 %v1298_v6  ;;  %1100 = vmatprep.subr.bf16.mxu0 %v1257_v0  ;;  %s1228_s28 = scalar_lea.vmem %s936_s27, 16  ;;  %s1232_s29 = scalar_lea.vmem %s936_s27, 32 }
  0x19   :  { %1106 = vmatprep.subr.bf16.mxu1 %v1257_v0  ;;  %p1229_p8 = scmp.ne.s32.totalorder %s936_s27, %s1228_s28  ;;  %p1233_p9 = scmp.lt.s32.totalorder %s936_s27, %s936_s27 }
  0x1a   :  { %p1234_p10 = scmp.lt.s32.totalorder %s1232_s29, %s1228_s28 }
  0x1b   :  { %1102 = vmatpush3.bf16.msra.mxu0 %v1304_v9 }
  0x1c   :  { %1108 = vmatpush3.bf16.msra.mxu1 %v1304_v9  ;;  %1109 = vmatprep.subr.bf16.mxu0 %v1257_v0  ;;  %p1235_p11 = por %p1234_p10, %p1233_p9 }
  0x1d   :  { %1115 = vmatprep.subr.bf16.mxu1 %v1257_v0 }
  0x1e   :  { %1018 = vmatmul.mubr.f32.vlgmr.msra.gmra.mrb[0].mxu0 %v1259_v1  ;;  %p1236_p12 = pnand %p1235_p11, %p1229_p8 }
  0x1f   :  { %1111 = vmatpush3.bf16.msra.mxu0 %v1298_v6  ;;  %1039 = vmatprep.mubr.msk.f32.mxu0 %vm1258_vm0, %v1259_v1 }
  0x20   :  { %1112 = vmatprep.subr.bf16.mxu0 %v1257_v0 }
  0x23   :  { %1114 = vmatpush3.bf16.msra.mxu0 %v1304_v9 }
  0x24   :  { %1121 = vmatprep.subr.bf16.mxu0 %v1257_v0 }
  0x96   :  { %v36_v10 = vpop.permute.xlu0 %35 }
  0x97   :  { %v42_v12 = vmul.f32 %v944_v11, %v36_v10 }
  0x99   :  { %v1320_v14 = vadd.f32 %v945_v13, %v42_v12 }
  0xf1   :  { %v118_v15 = vpop.f32.mrb[0].mxu0 }
  0xf2   :  { %v122_v16 = vadd.f32 %v118_v15, %v1320_v14  ;;  %v1019_v17 = vpop.f32.mrb[1].mxu0 }
  0xf4   :  { %v946_v18 = vmul.f32 -1.442695, %v122_v16 }
  0xf6   :  { %1158 = vpow2.f32 %v946_v18 }
 0x100   :  { %v1159_v19 = vpop.eup %1158 }
 0x101   :  { %v126_v20 = vadd.f32 1.0, %v1159_v19 }
 0x103   :  { %1160 = vrcp.f32 %v126_v20 }
 0x10d   :  { %v1161_v21 = vpop.eup %1160 }
 0x10e   :  { %v129_v22 = vmul.f32 2.0, %v1161_v21  ;;  %v131_v26 = vmul.f32 0.0, %v1161_v21 }
 0x110   :  { %v947_v23 = vadd.f32 -1.0, %v129_v22 }
 0x112   :  { %133 = vrot.lane.b32.xlu0 %v947_v23, %s1261_s0 }
 0x184   :  { %v134_v24 = vpop.permute.xlu0 %133 }
 0x185   :  { %v136_v25 = vmul.f32 %v1161_v21, %v134_v24 }
 0x187   :  { %138 = vrot.lane.b32.xlu1 %v136_v25, %s1262_s24 }
 0x1f9   :  { %v139_v27 = vpop.permute.xlu1 %138 }
 0x1fa   :  { %v141_v28 = vadd.f32 %v139_v27, %v131_v26 }
 0x1fc   :  { %1162 = vtanh.f32 %v141_v28  ;;  %v236_v45 = vrot.slane %v141_v28, 7 }
 0x206   :  { %v1163_v29 = vpop.eup %1162 }
 0x207   :  { %144 = vrot.lane.b32.xlu1 %v1163_v29, %s1261_s0 }
 0x279   :  { %v145_v30 = vpop.permute.xlu1 %144 }
 0x27a   :  { %v147_v31 = vmul.f32 %v1161_v21, %v145_v30 }
 0x27c   :  { %149 = vrot.lane.b32.xlu0 %v147_v31, %s1262_s24 }
 0x2ee   :  { %v150_v32 = vpop.permute.xlu0 %149 }
 0x2ef   :  { %1029 = vmatmul.mubr.msk.f32.vlgmr.msra.gmra.mrb[0].mxu1 %vm48_vm1, %v150_v32 }
 0x2f0   :  { %1117 = vmatpush3.bf16.msra.mxu1 %v1298_v6  ;;  %1050 = vmatprep.mubr.msk.f32.mxu1 %vm1258_vm0, %v1259_v1 }
 0x2f1   :  { %1118 = vmatprep.subr.bf16.mxu1 %v1257_v0 }
 0x2f4   :  { %1120 = vmatpush3.bf16.msra.mxu1 %v1304_v9 }
 0x2f5   :  { %1127 = vmatprep.subr.bf16.mxu1 %v1257_v0 }
 0x3c2   :  { %v219_v33 = vpop.f32.mrb[0].mxu1 }
 0x3c3   :  { %v224_v34 = vrot.slane %v219_v33, 7  ;;  %v1030_v35 = vpop.f32.mrb[1].mxu1 }
 0x3c5   :  { %v226_v36 = vadd.f32 %v224_v34, %v1320_v14 }
 0x3c7   :  { %v949_v37 = vmul.f32 -1.442695, %v226_v36 }
 0x3c9   :  { %1164 = vpow2.f32 %v949_v37 }
 0x3d3   :  { %v1165_v38 = vpop.eup %1164 }
 0x3d4   :  { %v230_v39 = vadd.f32 1.0, %v1165_v38 }
 0x3d6   :  { %1166 = vrcp.f32 %v230_v39 }
 0x3e0   :  { %v1167_v40 = vpop.eup %1166 }
 0x3e1   :  { %v233_v41 = vmul.f32 2.0, %v1167_v40  ;;  %v238_v46 = vmul.f32 %v1167_v40, %v236_v45 }
 0x3e3   :  { %v950_v42 = vadd.f32 -1.0, %v233_v41 }
 0x3e5   :  { %240 = vrot.lane.b32.xlu1 %v950_v42, %s1261_s0 }
 0x457   :  { %v241_v43 = vpop.permute.xlu1 %240 }
 0x458   :  { %v243_v44 = vmul.f32 %v1167_v40, %v241_v43 }
 0x45a   :  { %245 = vrot.lane.b32.xlu0 %v243_v44, %s1262_s24 }
 0x4cc   :  { %v246_v47 = vpop.permute.xlu0 %245 }
 0x4cd   :  { %v248_v48 = vadd.f32 %v246_v47, %v238_v46 }
 0x4cf   :  { %1168 = vtanh.f32 %v248_v48  ;;  %v344_v4 = vrot.slane %v248_v48, 7 }
 0x4d9   :  { %v1169_v49 = vpop.eup %1168 }
 0x4da   :  { %251 = vrot.lane.b32.xlu1 %v1169_v49, %s1261_s0 }
 0x54c   :  { %v252_v50 = vpop.permute.xlu1 %251 }
 0x54d   :  { %v254_v51 = vmul.f32 %v1167_v40, %v252_v50 }
 0x54f   :  { %v256_v52 = vrot.slane %v254_v51, 1 }
 0x551   :  { %257 = vrot.lane.b32.xlu0 %v256_v52, %s1262_s24 }
 0x5c3   :  { %v258_v53 = vpop.permute.xlu0 %257 }
 0x5c4   :  { %1040 = vmatmul.mubr.msk.f32.vlgmr.msra.gmra.mrb[2].mxu0 %vm48_vm1, %v258_v53 }
 0x5c5   :  { %1123 = vmatpush3.bf16.msra.mxu0 %v1298_v6  ;;  %1061 = vmatprep.mubr.msk.f32.mxu0 %vm1258_vm0, %v1259_v1 }
 0x5c6   :  { %1124 = vmatprep.subr.bf16.mxu0 %v1257_v0 }
 0x5c9   :  { %1126 = vmatpush3.bf16.msra.mxu0 %v1304_v9 }
 0x5ca   :  { %1133 = vmatprep.subr.bf16.mxu0 %v1257_v0 }
 0x697   :  { %v327_v54 = vpop.f32.mrb[2].mxu0 }
 0x698   :  { %v332_v55 = vrot.slane %v327_v54, 6  ;;  %v1041_v56 = vpop.f32.mrb[3].mxu0 }
 0x69a   :  { %v334_v57 = vadd.f32 %v332_v55, %v1320_v14 }
 0x69c   :  { %v952_v58 = vmul.f32 -1.442695, %v334_v57 }
 0x69e   :  { %1170 = vpow2.f32 %v952_v58 }
 0x6a8   :  { %v1171_v59 = vpop.eup %1170 }
 0x6a9   :  { %v338_v60 = vadd.f32 1.0, %v1171_v59 }
 0x6ab   :  { %1172 = vrcp.f32 %v338_v60 }
 0x6b5   :  { %v1173_v61 = vpop.eup %1172 }
 0x6b6   :  { %v341_v62 = vmul.f32 2.0, %v1173_v61  ;;  %v346_v5 = vmul.f32 %v1173_v61, %v344_v4 }
 0x6b8   :  { %v953_v63 = vadd.f32 -1.0, %v341_v62 }
 0x6ba   :  { %348 = vrot.lane.b32.xlu1 %v953_v63, %s1261_s0 }
 0x72c   :  { %v349_v2 = vpop.permute.xlu1 %348 }
 0x72d   :  { %v351_v3 = vmul.f32 %v1173_v61, %v349_v2 }
 0x72f   :  { %353 = vrot.lane.b32.xlu0 %v351_v3, %s1262_s24 }
 0x7a1   :  { %v354_v7 = vpop.permute.xlu0 %353 }
 0x7a2   :  { %v356_v8 = vadd.f32 %v354_v7, %v346_v5 }
 0x7a4   :  { %1174 = vtanh.f32 %v356_v8  ;;  %v452_v28 = vrot.slane %v356_v8, 7 }
 0x7ae   :  { %v1175_v10 = vpop.eup %1174 }
 0x7af   :  { %359 = vrot.lane.b32.xlu1 %v1175_v10, %s1261_s0 }
 0x821   :  { %v360_v11 = vpop.permute.xlu1 %359 }
 0x822   :  { %v362_v12 = vmul.f32 %v1173_v61, %v360_v11 }
 0x824   :  { %v364_v13 = vrot.slane %v362_v12, 2 }
 0x826   :  { %365 = vrot.lane.b32.xlu0 %v364_v13, %s1262_s24 }
 0x898   :  { %v366_v15 = vpop.permute.xlu0 %365 }
 0x899   :  { %1051 = vmatmul.mubr.msk.f32.vlgmr.msra.gmra.mrb[2].mxu1 %vm48_vm1, %v366_v15 }
 0x89a   :  { %1129 = vmatpush3.bf16.msra.mxu1 %v1298_v6  ;;  %1072 = vmatprep.mubr.msk.f32.mxu1 %vm1258_vm0, %v1259_v1 }
 0x89b   :  { %1130 = vmatprep.subr.bf16.mxu1 %v1257_v0 }
 0x89e   :  { %1132 = vmatpush3.bf16.msra.mxu1 %v1304_v9 }
 0x89f   :  { %1139 = vmatprep.subr.bf16.mxu1 %v1257_v0 }
 0x96c   :  { %v435_v16 = vpop.f32.mrb[2].mxu1 }
 0x96d   :  { %v440_v17 = vrot.slane %v435_v16, 5  ;;  %v1052_v18 = vpop.f32.mrb[3].mxu1 }
 0x96f   :  { %v442_v19 = vadd.f32 %v440_v17, %v1320_v14 }
 0x971   :  { %v955_v20 = vmul.f32 -1.442695, %v442_v19 }
 0x973   :  { %1176 = vpow2.f32 %v955_v20 }
 0x97d   :  { %v1177_v21 = vpop.eup %1176 }
 0x97e   :  { %v446_v22 = vadd.f32 1.0, %v1177_v21 }
 0x980   :  { %1178 = vrcp.f32 %v446_v22 }
 0x98a   :  { %v1179_v23 = vpop.eup %1178 }
 0x98b   :  { %v449_v24 = vmul.f32 2.0, %v1179_v23  ;;  %v454_v29 = vmul.f32 %v1179_v23, %v452_v28 }
 0x98d   :  { %v956_v25 = vadd.f32 -1.0, %v449_v24 }
 0x98f   :  { %456 = vrot.lane.b32.xlu1 %v956_v25, %s1261_s0 }
 0xa01   :  { %v457_v26 = vpop.permute.xlu1 %456 }
 0xa02   :  { %v459_v27 = vmul.f32 %v1179_v23, %v457_v26 }
 0xa04   :  { %461 = vrot.lane.b32.xlu0 %v459_v27, %s1262_s24 }
 0xa76   :  { %v462_v30 = vpop.permute.xlu0 %461 }
 0xa77   :  { %v464_v31 = vadd.f32 %v462_v30, %v454_v29 }
 0xa79   :  { %1180 = vtanh.f32 %v464_v31  ;;  %v560_v49 = vrot.slane %v464_v31, 7 }
 0xa83   :  { %v1181_v32 = vpop.eup %1180 }
 0xa84   :  { %467 = vrot.lane.b32.xlu1 %v1181_v32, %s1261_s0 }
 0xaf6   :  { %v468_v33 = vpop.permute.xlu1 %467 }
 0xaf7   :  { %v470_v34 = vmul.f32 %v1179_v23, %v468_v33 }
 0xaf9   :  { %v472_v35 = vrot.slane %v470_v34, 3 }
 0xafb   :  { %473 = vrot.lane.b32.xlu0 %v472_v35, %s1262_s24 }
 0xb6d   :  { %v474_v36 = vpop.permute.xlu0 %473 }
 0xb6e   :  { %1062 = vmatmul.mubr.msk.f32.vlgmr.msra.gmra.mrb[4].mxu0 %vm48_vm1, %v474_v36 }
 0xb6f   :  { %1135 = vmatpush3.bf16.msra.mxu0 %v1298_v6  ;;  %1083 = vmatprep.mubr.msk.f32.mxu0 %vm1258_vm0, %v1259_v1 }
 0xb70   :  { %1136 = vmatprep.subr.bf16.mxu0 %v1257_v0 }
 0xb73   :  { %1138 = vmatpush3.bf16.msra.mxu0 %v1304_v9 }
 0xc41   :  { %v543_v37 = vpop.f32.mrb[4].mxu0 }
 0xc42   :  { %v548_v38 = vrot.slane %v543_v37, 4  ;;  %v1063_v39 = vpop.f32.mrb[5].mxu0 }
 0xc44   :  { %v550_v40 = vadd.f32 %v548_v38, %v1320_v14 }
 0xc46   :  { %v958_v41 = vmul.f32 -1.442695, %v550_v40 }
 0xc48   :  { %1182 = vpow2.f32 %v958_v41 }
 0xc52   :  { %v1183_v42 = vpop.eup %1182 }
 0xc53   :  { %v554_v43 = vadd.f32 1.0, %v1183_v42 }
 0xc55   :  { %1184 = vrcp.f32 %v554_v43 }
 0xc5f   :  { %v1185_v44 = vpop.eup %1184 }
 0xc60   :  { %v557_v45 = vmul.f32 2.0, %v1185_v44  ;;  %v562_v50 = vmul.f32 %v1185_v44, %v560_v49  ;;  %v903_v49 = vld [vmem:[#allocation2 + $0x22] sm:$0x1] }
 0xc62   :  { %v959_v46 = vadd.f32 -1.0, %v557_v45 }
 0xc64   :  { %564 = vrot.lane.b32.xlu1 %v959_v46, %s1261_s0 }
 0xcd6   :  { %v565_v47 = vpop.permute.xlu1 %564 }
 0xcd7   :  { %v567_v48 = vmul.f32 %v1185_v44, %v565_v47 }
 0xcd9   :  { %569 = vrot.lane.b32.xlu0 %v567_v48, %s1262_s24 }
 0xd4b   :  { %v570_v51 = vpop.permute.xlu0 %569 }
 0xd4c   :  { %v572_v52 = vadd.f32 %v570_v51, %v562_v50  ;;  %v906_v50 = vrot.slane %v903_v49, 1 }
 0xd4e   :  { %1186 = vtanh.f32 %v572_v52 }
 0xd58   :  { %v1187_v53 = vpop.eup %1186 }
 0xd59   :  { %575 = vrot.lane.b32.xlu1 %v1187_v53, %s1261_s0 }
 0xdcb   :  { %v576_v54 = vpop.permute.xlu1 %575 }
 0xdcc   :  { %v578_v55 = vmul.f32 %v1185_v44, %v576_v54 }
 0xdce   :  { %v580_v56 = vrot.slane %v578_v55, 4 }
 0xdd0   :  { %581 = vrot.lane.b32.xlu0 %v580_v56, %s1262_s24 }
 0xe42   :  { %v582_v57 = vpop.permute.xlu0 %581 }
 0xe43   :  { %1073 = vmatmul.mubr.msk.f32.vlgmr.msra.gmra.mrb[4].mxu1 %vm48_vm1, %v582_v57 }
 0xe44   :  { %1141 = vmatpush3.bf16.msra.mxu1 %v1298_v6  ;;  %1094 = vmatprep.mubr.msk.f32.mxu1 %vm1258_vm0, %v1259_v1 }
 0xe45   :  { %1142 = vmatprep.subr.bf16.mxu1 %v1257_v0  ;;  %v668_v0 = vrot.slane %v572_v52, 7 }
 0xe48   :  { %1144 = vmatpush3.bf16.msra.mxu1 %v1304_v9 }
 0xf16   :  { %v651_v58 = vpop.f32.mrb[4].mxu1 }
 0xf17   :  { %v656_v59 = vrot.slane %v651_v58, 3  ;;  %v1074_v60 = vpop.f32.mrb[5].mxu1 }
 0xf19   :  { %v658_v61 = vadd.f32 %v656_v59, %v1320_v14 }
 0xf1b   :  { %v961_v62 = vmul.f32 -1.442695, %v658_v61  ;;  %v904_v61 = vld [vmem:[#allocation2 + $0x23] sm:$0x1] }
 0xf1d   :  { %1188 = vpow2.f32 %v961_v62  ;;  %v920_v62 = vrot.slane %v904_v61, 1 }
 0xf27   :  { %v1189_v63 = vpop.eup %1188 }
 0xf28   :  { %v662_v2 = vadd.f32 1.0, %v1189_v63 }
 0xf2a   :  { %1190 = vrcp.f32 %v662_v2 }
 0xf34   :  { %v1191_v3 = vpop.eup %1190 }
 0xf35   :  { %v665_v4 = vmul.f32 2.0, %v1191_v3  ;;  %v670_v9 = vmul.f32 %v1191_v3, %v668_v0 }
 0xf37   :  { %v962_v6 = vadd.f32 -1.0, %v665_v4 }
 0xf39   :  { %672 = vrot.lane.b32.xlu1 %v962_v6, %s1261_s0 }
 0xfab   :  { %v673_v1 = vpop.permute.xlu1 %672 }
 0xfac   :  { %v675_v5 = vmul.f32 %v1191_v3, %v673_v1 }
 0xfae   :  { %677 = vrot.lane.b32.xlu0 %v675_v5, %s1262_s24 }
0x1020   :  { %v678_v7 = vpop.permute.xlu0 %677 }
0x1021   :  { %v680_v8 = vadd.f32 %v678_v7, %v670_v9 }
0x1023   :  { %1192 = vtanh.f32 %v680_v8  ;;  %v776_v28 = vrot.slane %v680_v8, 7 }
0x102d   :  { %v1193_v10 = vpop.eup %1192 }
0x102e   :  { %683 = vrot.lane.b32.xlu1 %v1193_v10, %s1261_s0 }
0x10a0   :  { %v684_v11 = vpop.permute.xlu1 %683 }
0x10a1   :  { %v686_v12 = vmul.f32 %v1191_v3, %v684_v11 }
0x10a3   :  { %v688_v13 = vrot.slane %v686_v12, 5 }
0x10a5   :  { %689 = vrot.lane.b32.xlu0 %v688_v13, %s1262_s24 }
0x1117   :  { %v690_v15 = vpop.permute.xlu0 %689 }
0x1118   :  { %1084 = vmatmul.mubr.msk.f32.vlgmr.msra.gmra.mrb[6].mxu0 %vm48_vm1, %v690_v15 }
0x11eb   :  { %v759_v16 = vpop.f32.mrb[6].mxu0 }
0x11ec   :  { %v764_v17 = vrot.slane %v759_v16, 2  ;;  %v1085_v18 = vpop.f32.mrb[7].mxu0 }
0x11ee   :  { %v766_v19 = vadd.f32 %v764_v17, %v1320_v14 }
0x11f0   :  { %v964_v20 = vmul.f32 -1.442695, %v766_v19 }
0x11f2   :  { %1194 = vpow2.f32 %v964_v20 }
0x11fc   :  { %v1195_v21 = vpop.eup %1194 }
0x11fd   :  { %v770_v22 = vadd.f32 1.0, %v1195_v21 }
0x11ff   :  { %1196 = vrcp.f32 %v770_v22 }
0x1209   :  { %v1197_v23 = vpop.eup %1196 }
0x120a   :  { %v773_v24 = vmul.f32 2.0, %v1197_v23  ;;  %v778_v29 = vmul.f32 %v1197_v23, %v776_v28 }
0x120c   :  { %v965_v25 = vadd.f32 -1.0, %v773_v24 }
0x120e   :  { %780 = vrot.lane.b32.xlu1 %v965_v25, %s1261_s0 }
0x1280   :  { %v781_v26 = vpop.permute.xlu1 %780 }
0x1281   :  { %v783_v27 = vmul.f32 %v1197_v23, %v781_v26 }
0x1283   :  { %785 = vrot.lane.b32.xlu0 %v783_v27, %s1262_s24 }
0x12f5   :  { %v786_v30 = vpop.permute.xlu0 %785 }
0x12f6   :  { %v788_v31 = vadd.f32 %v786_v30, %v778_v29 }
0x12f8   :  { %1198 = vtanh.f32 %v788_v31  ;;  %v884_v51 = vrot.slane %v788_v31, 7 }
0x1302   :  { %v1199_v32 = vpop.eup %1198 }
0x1303   :  { %791 = vrot.lane.b32.xlu1 %v1199_v32, %s1261_s0 }
0x1375   :  { %v792_v33 = vpop.permute.xlu1 %791 }
0x1376   :  { %v794_v34 = vmul.f32 %v1197_v23, %v792_v33 }
0x1378   :  { %v796_v35 = vrot.slane %v794_v34, 6 }
0x137a   :  { %797 = vrot.lane.b32.xlu0 %v796_v35, %s1262_s24 }
0x13ec   :  { %v798_v36 = vpop.permute.xlu0 %797 }
0x13ed   :  { %1095 = vmatmul.mubr.msk.f32.vlgmr.msra.gmra.mrb[6].mxu1 %vm48_vm1, %v798_v36 }
0x14c0   :  { %v867_v37 = vpop.f32.mrb[6].mxu1 }
0x14c1   :  { %v872_v38 = vrot.slane %v867_v37, 1  ;;  %v1096_v39 = vpop.f32.mrb[7].mxu1 }
0x14c3   :  { %v874_v40 = vadd.f32 %v872_v38, %v1320_v14 }
0x14c5   :  { %v967_v41 = vmul.f32 -1.442695, %v874_v40 }
0x14c7   :  { %1200 = vpow2.f32 %v967_v41 }
0x14d1   :  { %v1201_v42 = vpop.eup %1200 }
0x14d2   :  { %v878_v43 = vadd.f32 1.0, %v1201_v42 }
0x14d4   :  { %1202 = vrcp.f32 %v878_v43 }
0x14de   :  { %v1203_v44 = vpop.eup %1202 }
0x14df   :  { %v881_v45 = vmul.f32 2.0, %v1203_v44  ;;  %v886_v14 = vmul.f32 %v1203_v44, %v884_v51 }
0x14e1   :  { %v968_v46 = vadd.f32 -1.0, %v881_v45 }
0x14e3   :  { %888 = vrot.lane.b32.xlu1 %v968_v46, %s1261_s0 }
0x1555   :  { %v889_v47 = vpop.permute.xlu1 %888 }
0x1556   :  { %v891_v48 = vmul.f32 %v1203_v44, %v889_v47 }
0x1558   :  { %893 = vrot.lane.b32.xlu0 %v891_v48, %s1262_s24 }
0x155c   :  { %907 = vrot.lane.b32.xlu0 %v906_v50, %s1263_s25 }
0x15ca   :  { %v894_v52 = vpop.permute.xlu0 %893 }
0x15cb   :  { %v896_v53 = vadd.f32 %v894_v52, %v886_v14 }
0x15cd   :  { %1204 = vtanh.f32 %v896_v53 }
0x15ce   :  { %v908_v56 = vpop.permute.xlu0 %907 }
0x15d7   :  { %v1205_v54 = vpop.eup %1204 }
0x15d8   :  { %899 = vrot.lane.b32.xlu1 %v1205_v54, %s1261_s0 }
0x164a   :  { %v900_v55 = vpop.permute.xlu1 %899 }
0x164b   :  { %v902_v57 = vmul.f32 %v1203_v44, %v900_v55 }
0x164d   :  { %v910_v58 = vmul.f32 %v908_v56, %v902_v57 }
0x164f   :  { %912 = vrot.lane.b32.xlu1 %v910_v58, %s1262_s24 }
0x16c1   :  { %v913_v59 = vpop.permute.xlu1 %912 }
0x16c2   :  { %v916_v60 = vsel %vm915_vm2, %v913_v59, 0.0 }
0x16c3   :  { %917 = vadd.xlane.f32.xlu0 %v916_v60 }
0x1750   :  { %v918_v63 = vpop.xlane.xlu0 %917 }
0x1751   :  { %v922_v2 = vadd.f32 %v920_v62, %v918_v63 }
0x1753   :  { %925 = vperm.xlu1 %1157, %v922_v2  }
0x17d2   :  { %v926_v3 = vpop.permute.xlu1 %925 }
0x17d3   :  { %928 = vst [vmem:[#allocation5 - $0x7] sm:$0x80] %v926_v3 }
0x17d4   :  { %1239 = shalt.err (!%p1236_p12)
}
0x17d5   :  { %s1240_s4 = scalar_lea.hbm %s1411_s2, 16 }
0x17d6   :  { %p1241_p13 = scmp.ne.s32.totalorder %s1411_s2, %s1240_s4  ;;  %p1244_p0 = scmp.lt.u32.totalorder %s1240_s4, %s1411_s2 }
0x17d8   :  { %p1246_p1 = pnand %p1244_p0, %p1241_p13 }
0x17da   :  { %1249 = shalt.err (!%p1246_p1)
}
0x17db   :  { %938 = dma.vmem_to_hbm [thread:$0]  %s936_s27, 16, %s1411_s2, [#allocation4]  }
0x17dc   :  { %1252 = dma.done.wait [#allocation4], 16  }
0x17dd   :  { %1253 = vsyncadd [#allocation4], 4294967280 }
0x17de   :  { %942 = vsyncpa [#allocation3], 1 }
0x17df   :  { %943 = vsyncpa [#allocation4], 1 }

</bundles_post_ra>
